<compile_context>
chip_gen: v7x
topology: tpu7x:2x2x1
jax: 0.10.0
libtpu: 0.0.40
codegen_flags: <defaults>
</compile_context>

<pallas_src>
import functools

import jax
import jax.numpy as jnp
import numpy as np
from jax import lax
from jax.experimental import pallas as pl
from jax.experimental.pallas import tpu as pltpu


def _round_up(v, m):
    return (v + m - 1) // m * m


def _vmem_budget_bytes():
    """Generation-aware VMEM budget: ~70% of physical, capped at 100 MiB."""
    cap = 64 * 1024 * 1024  # conservative default (v7x physical)
    try:
        cap = int(pltpu.get_tpu_info().vmem_capacity_bytes)
    except Exception:
        pass
    return min(int(cap * 0.7), 100 * 1024 * 1024)


_VMEM_BUDGET = _vmem_budget_bytes()


def _pick_row_tile(hout, wout, target_lanes):
    """Largest row tile TH dividing hout with TH*wout % 128 == 0 and <= target_lanes."""
    divs = [d for d in range(1, hout + 1) if hout % d == 0]
    valid = [d for d in divs if (d * wout) % 128 == 0]
    if not valid:
        return hout          # single full-sample tile (block == full dim -> allowed)
    under = [d for d in valid if d * wout <= target_lanes]
    return max(under) if under else min(valid)


# ---------------------------------------------------------------------------
# Kernels
# ---------------------------------------------------------------------------

def _fused_kernel(xs_ref, wg_ref, alpha_ref, o_ref, s1_ref, *,
                  n_tiles, tile_hw, inv_hw, norm, use_act, eps):
    """Conv (one MXU matmul per HW tile) + InstanceNorm + PReLU, fully fused.

    The per-sample conv output stays resident in the revisited output block
    (VMEM); per-channel sums are accumulated across HW tiles, and at the last
    tile the variance is recomputed from the resident data (stable two-pass
    formula) and normalize + PReLU are applied in place.
    """
    acc = jnp.dot(wg_ref[...], xs_ref[0],
                  preferred_element_type=jnp.float32)       # (Cout_p, tile_hw)

    if n_tiles == 1:
        y = acc
        if norm:
            ones = jnp.ones((tile_hw, 1), jnp.float32)
            mean = jnp.dot(y, ones, preferred_element_type=jnp.float32) * inv_hw
            d = y - mean
            var = jnp.dot(d * d, ones, preferred_element_type=jnp.float32) * inv_hw
            y = d * lax.rsqrt(var + eps)
        if use_act:
            y = jnp.where(y >= 0.0, y, alpha_ref[...] * y)
        o_ref[0] = y
        return

    t = pl.program_id(1)
    start = pl.multiple_of(t * tile_hw, 128)                # tile_hw % 128 == 0 here

    if not norm:
        y = acc
        if use_act:
            y = jnp.where(y >= 0.0, y, alpha_ref[...] * y)
        o_ref[0, :, pl.ds(start, tile_hw)] = y
        return

    @pl.when(t == 0)
    def _init():
        s1_ref[...] = jnp.zeros(s1_ref.shape, s1_ref.dtype)

    ones = jnp.ones((tile_hw, 1), jnp.float32)
    # Per-channel sum via MXU (keeps the XLU / store slots free).
    s1_ref[...] += jnp.dot(acc, ones, preferred_element_type=jnp.float32)
    o_ref[0, :, pl.ds(start, tile_hw)] = acc                # resident in VMEM

    @pl.when(t == pl.num_programs(1) - 1)
    def _finalize():
        cdim = o_ref.shape[1]
        mean = s1_ref[...] * inv_hw

        def _ssq(i, carry):
            st = pl.multiple_of(i * tile_hw, 128)
            d = o_ref[0, :, pl.ds(st, tile_hw)] - mean
            return carry + jnp.dot(d * d, ones, preferred_element_type=jnp.float32)

        ssq = lax.fori_loop(0, n_tiles, _ssq,
                            jnp.zeros((cdim, 1), jnp.float32))
        inv_std = lax.rsqrt(ssq * inv_hw + eps)
        a = alpha_ref[...]

        def _apply(i, carry):
            st = pl.multiple_of(i * tile_hw, 128)
            yt = (o_ref[0, :, pl.ds(st, tile_hw)] - mean) * inv_std
            if use_act:
                yt = jnp.where(yt >= 0.0, yt, a * yt)
            o_ref[0, :, pl.ds(st, tile_hw)] = yt
            return carry

        lax.fori_loop(0, n_tiles, _apply, 0)


def _conv_stats_kernel(xs_ref, wg_ref, y_ref, s1_ref, s2_ref, *, tile_hw, norm):
    """Fallback pass 1: conv per HW tile + per-channel sum / sum-of-squares."""
    acc = jnp.dot(wg_ref[...], xs_ref[0],
                  preferred_element_type=jnp.float32)       # (Cout_p, tile_hw)
    y_ref[0] = acc.astype(y_ref.dtype)

    @pl.when(pl.program_id(1) == 0)
    def _init():
        s1_ref[0] = jnp.zeros(s1_ref.shape[1:], s1_ref.dtype)
        s2_ref[0] = jnp.zeros(s2_ref.shape[1:], s2_ref.dtype)

    if norm:
        ones = jnp.ones((tile_hw, 1), jnp.float32)
        s1_ref[0] += jnp.dot(acc, ones, preferred_element_type=jnp.float32)
        s2_ref[0] += jnp.dot(acc * acc, ones, preferred_element_type=jnp.float32)


def _norm_act_kernel(y_ref, s1_ref, s2_ref, alpha_ref, o_ref, *,
                     inv_hw, norm, use_act, eps):
    """Fallback pass 2: fused InstanceNorm + PReLU over lane-dense tiles."""
    y = y_ref[0].astype(jnp.float32)
    if norm:
        mean = s1_ref[0] * inv_hw
        var = jnp.maximum(s2_ref[0] * inv_hw - mean * mean, 0.0)
        y = (y - mean) * lax.rsqrt(var + eps)
    if use_act:
        y = jnp.where(y >= 0.0, y, alpha_ref[...] * y)
    o_ref[0] = y.astype(o_ref.dtype)


# ---------------------------------------------------------------------------
# Wrapper
# ---------------------------------------------------------------------------

def conv_block(x, conv_weight, prelu_weight, *, stride, padding, norm=True,
               use_act=True, eps=1e-5, compute_dtype=jnp.bfloat16,
               hw_tile_lanes=4096, max_resident_bytes=None):
    """Forward pass of ConvBlock.

    x:            (N, Cin, H, W) float32, NCHW (PyTorch convention)
    conv_weight:  (Cout, Cin, k, k)
    prelu_weight: (Cout,)
    returns:      (N, Cout, Hout, Wout) float32
    """
    n, cin, h, w = x.shape
    cout, cin_w, k, k2 = conv_weight.shape
    assert cin_w == cin and k == k2
    s = stride

    hp, wp = h + 2 * padding, w + 2 * padding
    hout = (hp - k) // s + 1
    wout = (wp - k) // s + 1
    hw = hout * wout

    itemsize = np.dtype(compute_dtype).itemsize
    sub = 16 if itemsize < 4 else 8            # bf16 vregs pack [16,128]
    cout_p = _round_up(cout, sub)
    kdim = k * k * cin
    kdim_p = _round_up(kdim, sub)

    th = _pick_row_tile(hout, wout, hw_tile_lanes)
    n_tiles = hout // th
    tile_hw = th * wout
    inv_hw = 1.0 / hw

    # --- wrapper prep entirely in compute_dtype (bf16 by default) -----------
    xc = x.astype(compute_dtype)
    xp = jnp.pad(xc, ((0, 0), (0, 0), (padding, padding), (padding, padding)))
    # Stack all k*k conv taps along what becomes the MXU contraction dim ->
    # one deep matmul per HW tile instead of k^2 shallow dots.
    taps = [xp[:, :, ki:ki + s * hout:s, kj:kj + s * wout:s]
            for ki in range(k) for kj in range(k)]
    xs = jnp.stack(taps, axis=1).reshape(n, kdim, hw)       # (N, k*k*Cin, HW)
    xs = jnp.pad(xs, ((0, 0), (0, kdim_p - kdim), (0, 0)))

    wg = jnp.transpose(conv_weight, (2, 3, 1, 0)).reshape(kdim, cout)
    wg = jnp.pad(wg, ((0, kdim_p - kdim), (0, cout_p - cout)))
    wg = jnp.transpose(wg).astype(compute_dtype)            # (Cout_p, k*k*Cin_p)

    alpha = jnp.pad(prelu_weight.astype(jnp.float32),
                    (0, cout_p - cout)).reshape(cout_p, 1)

    # Residency gate: resident f32 output block + double-buffered inputs.
    resident_est = (2 * cout_p * hw * 4
                    + 3 * kdim_p * tile_hw * itemsize
                    + 2 * cout_p * kdim_p * itemsize
                    + 8 * cout_p * 4)
    budget = _VMEM_BUDGET if max_resident_bytes is None else max_resident_bytes

    if resident_est <= budget:
        # Fully fused single pallas_call: conv output never round-trips HBM.
        kern = functools.partial(_fused_kernel, n_tiles=n_tiles, tile_hw=tile_hw,
                                 inv_hw=inv_hw, norm=norm, use_act=use_act, eps=eps)
        out = pl.pallas_call(
            kern,
            out_shape=jax.ShapeDtypeStruct((n, cout_p, hw), jnp.float32),
            grid_spec=pltpu.PrefetchScalarGridSpec(
                num_scalar_prefetch=0,
                grid=(n, n_tiles),
                in_specs=[
                    pl.BlockSpec((1, kdim_p, tile_hw), lambda b, t: (b, 0, t)),
                    pl.BlockSpec((cout_p, kdim_p), lambda b, t: (0, 0)),
                    pl.BlockSpec((cout_p, 1), lambda b, t: (0, 0)),
                ],
                out_specs=pl.BlockSpec((1, cout_p, hw), lambda b, t: (b, 0, 0)),
                scratch_shapes=[pltpu.VMEM((cout_p, 1), jnp.float32)],
            ),
            compiler_params=pltpu.CompilerParams(
                dimension_semantics=("parallel", "arbitrary"),
                vmem_limit_bytes=_VMEM_BUDGET),
        )(xs, wg, alpha)
    else:
        # Two-pass fallback (very large HW): bf16 intermediate conv output.
        y_dtype = compute_dtype if (norm or use_act) else jnp.float32
        conv_kern = functools.partial(_conv_stats_kernel, tile_hw=tile_hw, norm=norm)
        y, s1, s2 = pl.pallas_call(
            conv_kern,
            out_shape=(jax.ShapeDtypeStruct((n, cout_p, hw), y_dtype),
                       jax.ShapeDtypeStruct((n, cout_p, 1), jnp.float32),
                       jax.ShapeDtypeStruct((n, cout_p, 1), jnp.float32)),
            grid_spec=pltpu.PrefetchScalarGridSpec(
                num_scalar_prefetch=0,
                grid=(n, n_tiles),
                in_specs=[
                    pl.BlockSpec((1, kdim_p, tile_hw), lambda b, t: (b, 0, t)),
                    pl.BlockSpec((cout_p, kdim_p), lambda b, t: (0, 0)),
                ],
                out_specs=(
                    pl.BlockSpec((1, cout_p, tile_hw), lambda b, t: (b, 0, t)),
                    pl.BlockSpec((1, cout_p, 1), lambda b, t: (b, 0, 0)),
                    pl.BlockSpec((1, cout_p, 1), lambda b, t: (b, 0, 0)),
                ),
            ),
            compiler_params=pltpu.CompilerParams(
                dimension_semantics=("parallel", "arbitrary"),
                vmem_limit_bytes=_VMEM_BUDGET),
        )(xs, wg)

        if norm or use_act:
            na_kern = functools.partial(_norm_act_kernel, inv_hw=inv_hw, norm=norm,
                                        use_act=use_act, eps=eps)
            out = pl.pallas_call(
                na_kern,
                out_shape=jax.ShapeDtypeStruct((n, cout_p, hw), jnp.float32),
                grid_spec=pltpu.PrefetchScalarGridSpec(
                    num_scalar_prefetch=0,
                    grid=(n, n_tiles),
                    in_specs=[
                        pl.BlockSpec((1, cout_p, tile_hw), lambda b, t: (b, 0, t)),
                        pl.BlockSpec((1, cout_p, 1), lambda b, t: (b, 0, 0)),
                        pl.BlockSpec((1, cout_p, 1), lambda b, t: (b, 0, 0)),
                        pl.BlockSpec((cout_p, 1), lambda b, t: (0, 0)),
                    ],
                    out_specs=pl.BlockSpec((1, cout_p, tile_hw), lambda b, t: (b, 0, t)),
                ),
                compiler_params=pltpu.CompilerParams(
                    dimension_semantics=("parallel", "parallel"),
                    vmem_limit_bytes=_VMEM_BUDGET),
            )(y, s1, s2, alpha)
        else:
            out = y

    # (N, Cout_pad, HW) is already channel-major: drop padding, free reshape.
    return out[:, :cout, :].reshape(n, cout, hout, wout)


# ---------------------------------------------------------------------------
# Reference + self-test
# ---------------------------------------------------------------------------

def _reference(x, conv_weight, prelu_weight, *, stride, padding, norm, use_act, eps=1e-5):
    y = lax.conv_general_dilated(
        x, conv_weight, window_strides=(stride, stride),
        padding=((padding, padding), (padding, padding)),
        dimension_numbers=("NCHW", "OIHW", "NCHW"))
    if norm:
        mean = jnp.mean(y, axis=(2, 3), keepdims=True)
        var = jnp.var(y, axis=(2, 3), keepdims=True)
        y = (y - mean) * lax.rsqrt(var + eps)
    if use_act:
        a = prelu_weight.reshape(1, -1, 1, 1)
        y = jnp.where(y >= 0, y, a * y)
    return y


if __name__ == "__main__":
    key = jax.random.PRNGKey(0)
    kx, kw = jax.random.split(key)

    # ConvBlock(in_channels=4, out_channels=8, kernel_size=3, stride=1, padding=1,
    #           norm=True, use_act=True)
    N, CIN, H, W = 2, 4, 16, 16
    COUT, K = 8, 3

    x = jax.random.normal(kx, (N, CIN, H, W), dtype=jnp.float32)
    bound = 1.0 / (CIN * K * K) ** 0.5
    conv_w = jax.random.uniform(kw, (COUT, CIN, K, K), dtype=jnp.float32,
                                minval=-bound, maxval=bound)
    prelu_w = jnp.full((COUT,), 0.25, dtype=jnp.float32)

    common = dict(stride=1, padding=1, norm=True, use_act=True)
    ref = _reference(x, conv_w, prelu_w, **common)

    # 1) f32, HW split into 2 tiles -> resident accumulator + in-place finalize.
    f_tiled = jax.jit(functools.partial(conv_block, **common,
                                        compute_dtype=jnp.float32,
                                        hw_tile_lanes=128))
    out_tiled = jax.block_until_ready(f_tiled(x, conv_w, prelu_w))
    assert out_tiled.shape == (N, COUT, H, W)
    assert jnp.allclose(out_tiled, ref, atol=2e-3, rtol=2e-3)

    # 2) f32, single tile per sample.
    f_one = jax.jit(functools.partial(conv_block, **common,
                                      compute_dtype=jnp.float32))
    out_one = jax.block_until_ready(f_one(x, conv_w, prelu_w))
    assert jnp.allclose(out_one, ref, atol=2e-3, rtol=2e-3)

    # 3) Production path: bf16 MXU operands (f32 accumulation / f32 norm), tiled.
    f_bf16 = jax.jit(functools.partial(conv_block, **common,
                                       compute_dtype=jnp.bfloat16,
                                       hw_tile_lanes=128))
    out_bf16 = jax.block_until_ready(f_bf16(x, conv_w, prelu_w))
    assert jnp.allclose(out_bf16, ref, atol=5e-2, rtol=5e-2)

    # 4) Forced two-pass fallback (exercises the large-HW path).
    f_fb = jax.jit(functools.partial(conv_block, **common,
                                     compute_dtype=jnp.float32,
                                     hw_tile_lanes=128, max_resident_bytes=0))
    out_fb = jax.block_until_ready(f_fb(x, conv_w, prelu_w))
    assert jnp.allclose(out_fb, ref, atol=2e-3, rtol=2e-3)

    # 5) Strided conv (stride=2, padding=1), norm + PReLU.
    common2 = dict(stride=2, padding=1, norm=True, use_act=True)
    ref2 = _reference(x, conv_w, prelu_w, **common2)
    f_s2 = jax.jit(functools.partial(conv_block, **common2,
                                     compute_dtype=jnp.float32))
    out_s2 = jax.block_until_ready(f_s2(x, conv_w, prelu_w))
    assert out_s2.shape == (N, COUT, 8, 8)
    assert jnp.allclose(out_s2, ref2, atol=2e-3, rtol=2e-3)

    print("KERNEL_OK")
</pallas_src>

<mosaic_0001>
module attributes {stable_mosaic.version = 11 : i64} {
  func.func @_fused_kernel(%arg0: i32, %arg1: i32, %arg2: memref<1x40x128xf32, #tpu.memory_space<vmem>>, %arg3: memref<8x40xf32, #tpu.memory_space<vmem>>, %arg4: memref<8x1xf32, #tpu.memory_space<vmem>>, %arg5: memref<1x8x256xf32, #tpu.memory_space<vmem>>, %arg6: memref<8x1xf32, #tpu.memory_space<vmem>>) attributes {dimension_semantics = [#tpu.dimension_semantics<parallel>, #tpu.dimension_semantics<arbitrary>], iteration_bounds = array<i64: 2, 2>, scalar_prefetch = 0 : i64, scratch_operands = 1 : i64, tpu.core_type = #tpu.core_type<tc>, window_params = [{transform_indices = @transform_0, window_bounds = array<i64: 1, 40, 128>}, {pipeline_mode = #tpu.pipeline_mode<synchronous>, transform_indices = @transform_1, window_bounds = array<i64: 8, 40>}, {pipeline_mode = #tpu.pipeline_mode<synchronous>, transform_indices = @transform_2, window_bounds = array<i64: 8, 1>}, {transform_indices = @transform_3, window_bounds = array<i64: 1, 8, 256>}]} {
    %c0 = arith.constant 0 : index
    %c0_0 = arith.constant 0 : index
    %0 = vector.load %arg3[%c0, %c0_0] : memref<8x40xf32, #tpu.memory_space<vmem>>, vector<8x40xf32>
    %c0_1 = arith.constant 0 : index
    %c0_2 = arith.constant 0 : index
    %c0_3 = arith.constant 0 : index
    %1 = vector.load %arg2[%c0_1, %c0_2, %c0_3] : memref<1x40x128xf32, #tpu.memory_space<vmem>>, vector<1x40x128xf32>
    %2 = vector.shape_cast %1 : vector<1x40x128xf32> to vector<40x128xf32>
    %cst = arith.constant dense<0.000000e+00> : vector<8x128xf32>
    %3 = tpu.matmul %0, %2, %cst {dimension_numbers = #tpu.dot_dimension_numbers<[1], [0], [0], [1], [0, 0, 1, 1], [], []>} : vector<8x40xf32>, vector<40x128xf32>, vector<8x128xf32> -> vector<8x128xf32>
    %c128_i32 = arith.constant 128 : i32
    %4 = arith.muli %arg1, %c128_i32 : i32
    %5 = tpu.assume_multiple %4, 128 : i32
    %c0_i32 = arith.constant 0 : i32
    %6 = arith.cmpi eq, %arg1, %c0_i32 : i32
    %7 = arith.extui %6 : i1 to i32
    %c0_i32_4 = arith.constant 0 : i32
    %8 = arith.cmpi ne, %7, %c0_i32_4 : i32
    scf.if %8 {
      %cst_14 = arith.constant 0.000000e+00 : f32
      %21 = vector.broadcast %cst_14 : f32 to vector<8x1xf32>
      %c0_15 = arith.constant 0 : index
      %c0_16 = arith.constant 0 : index
      %22 = vector.load %arg6[%c0_15, %c0_16] : memref<8x1xf32, #tpu.memory_space<vmem>>, vector<8x1xf32>
      tpu.vector_store %arg6[%c0_15, %c0_16], %21 {strides = array<i32>} : memref<8x1xf32, #tpu.memory_space<vmem>>, vector<8x1xf32>,
    } else {
    }
    %cst_5 = arith.constant 1.000000e+00 : f32
    %9 = vector.broadcast %cst_5 : f32 to vector<128x1xf32>
    %c0_6 = arith.constant 0 : index
    %c0_7 = arith.constant 0 : index
    %10 = vector.load %arg6[%c0_6, %c0_7] : memref<8x1xf32, #tpu.memory_space<vmem>>, vector<8x1xf32>
    %cst_8 = arith.constant dense<0.000000e+00> : vector<8x1xf32>
    %11 = tpu.matmul %3, %9, %cst_8 {dimension_numbers = #tpu.dot_dimension_numbers<[1], [0], [0], [1], [0, 0, 1, 1], [], []>} : vector<8x128xf32>, vector<128x1xf32>, vector<8x1xf32> -> vector<8x1xf32>
    %12 = arith.addf %10, %11 : vector<8x1xf32>
    %c0_9 = arith.constant 0 : index
    %c0_10 = arith.constant 0 : index
    %13 = vector.load %arg6[%c0_9, %c0_10] : memref<8x1xf32, #tpu.memory_space<vmem>>, vector<8x1xf32>
    tpu.vector_store %arg6[%c0_9, %c0_10], %12 {strides = array<i32>} : memref<8x1xf32, #tpu.memory_space<vmem>>, vector<8x1xf32>,
    %c0_11 = arith.constant 0 : index
    %c0_12 = arith.constant 0 : index
    %14 = arith.index_cast %5 : i32 to index
    %15 = vector.load %arg5[%c0_11, %c0_12, %14] : memref<1x8x256xf32, #tpu.memory_space<vmem>>, vector<1x8x128xf32>
    %16 = vector.shape_cast %15 : vector<1x8x128xf32> to vector<8x128xf32>
    %17 = vector.shape_cast %3 : vector<8x128xf32> to vector<1x8x128xf32>
    tpu.vector_store %arg5[%c0_11, %c0_12, %14], %17 {strides = array<i32>} : memref<1x8x256xf32, #tpu.memory_space<vmem>>, vector<1x8x128xf32>,
    %c1_i32 = arith.constant 1 : i32
    %18 = arith.cmpi eq, %arg1, %c1_i32 : i32
    %19 = arith.extui %18 : i1 to i32
    %c0_i32_13 = arith.constant 0 : i32
    %20 = arith.cmpi ne, %19, %c0_i32_13 : i32
    scf.if %20 {
      %c0_14 = arith.constant 0 : index
      %c0_15 = arith.constant 0 : index
      %21 = vector.load %arg6[%c0_14, %c0_15] : memref<8x1xf32, #tpu.memory_space<vmem>>, vector<8x1xf32>
      %cst_16 = arith.constant 3.906250e-03 : f32
      %22 = vector.broadcast %cst_16 : f32 to vector<8x1xf32>
      %23 = arith.mulf %21, %22 : vector<8x1xf32>
      %cst_17 = arith.constant 0.000000e+00 : f32
      %24 = vector.broadcast %cst_17 : f32 to vector<8x1xf32>
      %c0_i32_18 = arith.constant 0 : i32
      %c2_i32 = arith.constant 2 : i32
      %25 = arith.addi %c0_i32_18, %c2_i32 : i32
      %c1_i32_19 = arith.constant 1 : i32
      %26 = scf.for %arg7 = %c0_i32_18 to %25 step %c1_i32_19 iter_args(%arg8 = %24) -> (vector<8x1xf32>)  : i32 {
        %c128_i32_29 = arith.constant 128 : i32
        %34 = arith.muli %arg7, %c128_i32_29 : i32
        %35 = tpu.assume_multiple %34, 128 : i32
        %c0_30 = arith.constant 0 : index
        %c0_31 = arith.constant 0 : index
        %36 = arith.index_cast %35 : i32 to index
        %37 = vector.load %arg5[%c0_30, %c0_31, %36] : memref<1x8x256xf32, #tpu.memory_space<vmem>>, vector<1x8x128xf32>
        %38 = vector.shape_cast %37 : vector<1x8x128xf32> to vector<8x128xf32>
        %39 = vector.broadcast %23 : vector<8x1xf32> to vector<8x128xf32>
        %40 = arith.subf %38, %39 : vector<8x128xf32>
        %41 = arith.mulf %40, %40 : vector<8x128xf32>
        %cst_32 = arith.constant dense<0.000000e+00> : vector<8x1xf32>
        %42 = tpu.matmul %41, %9, %cst_32 {dimension_numbers = #tpu.dot_dimension_numbers<[1], [0], [0], [1], [0, 0, 1, 1], [], []>} : vector<8x128xf32>, vector<128x1xf32>, vector<8x1xf32> -> vector<8x1xf32>
        %43 = arith.addf %arg8, %42 : vector<8x1xf32>
        scf.yield %43 : vector<8x1xf32>
      }
      %c2_i32_20 = arith.constant 2 : i32
      %cst_21 = arith.constant 3.906250e-03 : f32
      %27 = vector.broadcast %cst_21 : f32 to vector<8x1xf32>
      %28 = arith.mulf %26, %27 : vector<8x1xf32>
      %cst_22 = arith.constant 9.99999974E-6 : f32
      %29 = vector.broadcast %cst_22 : f32 to vector<8x1xf32>
      %30 = arith.addf %28, %29 : vector<8x1xf32>
      %31 = math.rsqrt %30 : vector<8x1xf32>
      %c0_23 = arith.constant 0 : index
      %c0_24 = arith.constant 0 : index
      %32 = vector.load %arg4[%c0_23, %c0_24] : memref<8x1xf32, #tpu.memory_space<vmem>>, vector<8x1xf32>
      %c0_i32_25 = arith.constant 0 : i32
      %c2_i32_26 = arith.constant 2 : i32
      %33 = arith.addi %c0_i32_25, %c2_i32_26 : i32
      %c1_i32_27 = arith.constant 1 : i32
      scf.for %arg7 = %c0_i32_25 to %33 step %c1_i32_27  : i32 {
        %c128_i32_29 = arith.constant 128 : i32
        %34 = arith.muli %arg7, %c128_i32_29 : i32
        %35 = tpu.assume_multiple %34, 128 : i32
        %c0_30 = arith.constant 0 : index
        %c0_31 = arith.constant 0 : index
        %36 = arith.index_cast %35 : i32 to index
        %37 = vector.load %arg5[%c0_30, %c0_31, %36] : memref<1x8x256xf32, #tpu.memory_space<vmem>>, vector<1x8x128xf32>
        %38 = vector.shape_cast %37 : vector<1x8x128xf32> to vector<8x128xf32>
        %39 = vector.broadcast %23 : vector<8x1xf32> to vector<8x128xf32>
        %40 = arith.subf %38, %39 : vector<8x128xf32>
        %41 = vector.broadcast %31 : vector<8x1xf32> to vector<8x128xf32>
        %42 = arith.mulf %40, %41 : vector<8x128xf32>
        %cst_32 = arith.constant 0.000000e+00 : f32
        %43 = vector.broadcast %cst_32 : f32 to vector<8x128xf32>
        %44 = arith.cmpf oge, %42, %43 : vector<8x128xf32>
        %45 = vector.broadcast %32 : vector<8x1xf32> to vector<8x128xf32>
        %46 = arith.mulf %45, %42 : vector<8x128xf32>
        %47 = arith.select %44, %42, %46 : vector<8x128xi1>, vector<8x128xf32>
        %c0_33 = arith.constant 0 : index
        %c0_34 = arith.constant 0 : index
        %48 = arith.index_cast %35 : i32 to index
        %49 = vector.load %arg5[%c0_33, %c0_34, %48] : memref<1x8x256xf32, #tpu.memory_space<vmem>>, vector<1x8x128xf32>
        %50 = vector.shape_cast %49 : vector<1x8x128xf32> to vector<8x128xf32>
        %51 = vector.shape_cast %47 : vector<8x128xf32> to vector<1x8x128xf32>
        tpu.vector_store %arg5[%c0_33, %c0_34, %48], %51 {strides = array<i32>} : memref<1x8x256xf32, #tpu.memory_space<vmem>>, vector<1x8x128xf32>,
      }
      %c2_i32_28 = arith.constant 2 : i32
    } else {
    }
    return
  }
  func.func @transform_0(%arg0: i32, %arg1: i32) -> (i32, i32, i32) {
    %c0_i32 = arith.constant 0 : i32
    %c0_i32_0 = arith.constant 0 : i32
    return %arg0, %c0_i32, %arg1 : i32, i32, i32
  }
  func.func @transform_1(%arg0: i32, %arg1: i32) -> (i32, i32) {
    %c0_i32 = arith.constant 0 : i32
    %c0_i32_0 = arith.constant 0 : i32
    %c0_i32_1 = arith.constant 0 : i32
    return %c0_i32, %c0_i32_0 : i32, i32
  }
  func.func @transform_2(%arg0: i32, %arg1: i32) -> (i32, i32) {
    %c0_i32 = arith.constant 0 : i32
    %c0_i32_0 = arith.constant 0 : i32
    %c0_i32_1 = arith.constant 0 : i32
    return %c0_i32, %c0_i32_0 : i32, i32
  }
  func.func @transform_3(%arg0: i32, %arg1: i32) -> (i32, i32, i32) {
    %c0_i32 = arith.constant 0 : i32
    %c0_i32_0 = arith.constant 0 : i32
    %c0_i32_1 = arith.constant 0 : i32
    return %arg0, %c0_i32, %c0_i32_0 : i32, i32, i32
  }
}

</mosaic_0001>

<bundles_post_ra>
// kernel: conv_block.1
= control target key start
LH: loop header
LB: loop body
LE: loop exit
PB: predicated region body
PF: predicated region fallthrough
CT: control target
= control target key end

     0   :  { %s1021_s12 = smov 0   ;;  %s1023_s13 = smov 0   ;;  %s1139_s0 = inlined_call_operand.vmem [shape: f32[2,40,256], index: 0, kind: input, shape index: {}]   ;;  %s1140_s1 = inlined_call_operand.vmem [shape: f32[8,40], index: 1, kind: input, shape index: {}]   ;;  %s1141_s2 = inlined_call_operand.vmem [shape: f32[8,1], index: 2, kind: input, shape index: {}]   ;;  %s1142_s3 = inlined_call_operand.vmem [shape: f32[2,8,256], index: 3, kind: output, shape index: {}]  }
   0x1   :  { %s1025_s14 = smov 0   ;;  %s1027_s15 = smov 0  }
   0x2   :  { %s1029_s16 = smov 0   ;;  %s1031_s17 = smov 0  }
   0x3   :  { %s1033_s18 = smov 0  }
   0x4 LB: > { %s22_s19 = sadd.s32 1, %s968_s16  ;;  %s25_s20 = sadd.s32 1, %s972_s17  ;;  %s976_s18 = sphi %s1033_s18, %s13_s18   ;;  %s972_s17 = sphi %s1031_s17, %s1148_s17   ;;  %s968_s16 = sphi %s1029_s16, %s1147_s16   ;;  %s964_s15 = sphi %s1027_s15, %s1146_s15   ;;  %s960_s14 = sphi %s1025_s14, %s1145_s14   ;;  %s956_s13 = sphi %s1023_s13, %s1144_s13   ;;  %s952_s12 = sphi %s1021_s12, %s1143_s12  }
   0x5   : > { %p23_p0 = scmp.ge.s32.totalorder %s22_s19, 2  ;;  %p41_p1 = scmp.ne.s32.totalorder %s956_s13, %s952_s12 }
   0x6   : > { %p42_p2 = scmp.eq.s32.totalorder %s976_s18, 0  ;;  %s34_s24 = sadd.s32 1, %s956_s13 }
   0x7   : > { %s1150_s19 = smov (%p23_p0, %s22_s19), 0  ;;  %s1152_s20 = smov (!%p23_p0, %s25_s20), %s972_s17 }
   0x8   : > { %p43_p3 = por %p42_p2, %p41_p1  ;;  %p27_p4 = scmp.ge.s32.totalorder %s1152_s20, 2 }
   0x9   : > { %s30_s21 = ssub.s32 %s968_s16, %s1150_s19  ;;  %p633_p6 = scmp.ge.s32.totalorder %s976_s18, 4 }
   0xa   : > { %s1154_s20 = smov (%p27_p4, %s1152_s20), 0 }
   0xb   : > { %s29_s22 = ssub.s32 %s972_s17, %s1154_s20  ;;  %141 = sbr.rel (%p633_p6) target bundleno = 28 (0x1c), region = 24 }
   0xc   : > { %s31_s23 = sor.u32 %s30_s21, %s29_s22 }
   0xd   : > { %p32_p5 = scmp.eq.s32.totalorder %s31_s23, 0 }
   0xf   : > { %s1072_s25 = scalar_select %p32_p5, %s956_s13, %s34_s24  }
  0x12   : > { %144 = sbr.rel (!%p43_p3) target bundleno = 28 (0x1c), region = 28  ;;  %s146_s26 = sand.u32 (%p43_p3), 1, %s956_s13  }
  0x13   : > { %s812_s27 = smul.u32 (%p43_p3), 10, %s972_s17 }
  0x14   : > { %s811_s28 = smul.u32 (%p43_p3), 40, %s146_s26 }
  0x15   : > { %s150_s29 = sadd.s32 (%p43_p3), %s968_s16, %s812_s27 }
  0x16   : > { %s634_s30 = sshll.u32 (%p43_p3), %s150_s29, 3  ;;  %s148_s7 = scalar_lea.vmem (%p43_p3), [#allocation3], %s811_s28 }
  0x17   : > { %s152_s6 = scalar_lea.vmem (%p43_p3), %s1139_s0, %s634_s30 }
  0x18   : > { %v188_v0 = vld [vmem:[%s152_s6] sm:$0xff] (%p43_p3)  ;;  %v190_v1 = vld [vmem:[%s152_s6 + $0x10] sm:$0xff] (%p43_p3) }
  0x19   : > { %v192_v2 = vld [vmem:[%s152_s6 + $0x20] sm:$0xff]  ;;  %189 = vst [vmem:[%s148_s7] sm:$0xff] %v188_v0  ;;  %191 = vst [vmem:[%s148_s7 + $0x8] sm:$0xff] %v190_v1  ;;  %v194_v3 = vld [vmem:[%s152_s6 + $0x30] sm:$0xff] }
  0x1a   : > { %193 = vst [vmem:[%s148_s7 + $0x10] sm:$0xff] %v192_v2  ;;  %v196_v4 = vld [vmem:[%s152_s6 + $0x40] sm:$0xff]  ;;  %195 = vst [vmem:[%s148_s7 + $0x18] sm:$0xff] %v194_v3 }
  0x1b   : > { %197 = vst [vmem:[%s148_s7 + $0x20] sm:$0xff] %v196_v4 }
  0x1c PF: > { %p635_p7 = scmp.ge.s32.totalorder %s976_s18, 1  ;;  %p202_p8 = scmp.lt.s32.totalorder %s976_s18, 5 }
  0x1e   : > { %p203_p9 = pnand %p635_p7, %p202_p8 }
  0x1f   : > { %p232_p10 = scmp.lt.s32.totalorder (!%p203_p9), %s964_s15, 1  ;;  %s209_s8 = sand.u32 (!%p203_p9), 1, %s952_s12   ;;  %v990_v5 = vmov (!%p203_p9), 0.0|0.0   ;;  %vm991_vm0 = vmmov (!%p203_p9), 0   ;;  %v992_v6 = vmov (!%p203_p9), 0.0   ;;  %v237_v14 = vld [vmem:[%s1140_s1] sm:$0xff] (!%p203_p9) }
  0x20   : > { %206 = sbr.rel (%p203_p9) target bundleno = 1019 (0x3fb), region = 66  ;;  %773 = vmatprep.subr.bf16.mxu0 (!%p203_p9), %v990_v5  ;;  %700 = vmatprep.mubr.msk.f32.mxu0 (!%p203_p9), %vm991_vm0, %v992_v6  ;;  %vm243_vm1 = vcmask (!%p203_p9), 326656   ;;  %s639_s24 = sshll.u32 (!%p203_p9), %s960_s14, 7 }
  0x21   : > { %s813_s9 = smul.u32 (!%p203_p9), 40, %s209_s8  ;;  %p640_p11 = scmp.ne.s32.totalorder (!%p203_p9), %s960_s14, 0 }
  0x23   : > { %s211_s11 = scalar_lea.vmem (!%p203_p9), [#allocation3], %s813_s9 }
  0x24   : > { %v238_v7 = vld [vmem:[%s211_s11] sm:$0xff] (!%p203_p9)  ;;  %v239_v8 = vld [vmem:[%s211_s11 + $0x8] sm:$0xff] (!%p203_p9)  ;;  %v240_v9 = vld [vmem:[%s211_s11 + $0x10] sm:$0xff] (!%p203_p9) }
  0x25   : > { %v774_v10 = vpack.c.bf16 (!%p203_p9), %v239_v8, %v238_v7  ;;  %v241_v11 = vld [vmem:[%s211_s11 + $0x18] sm:$0xff] (!%p203_p9)  ;;  %v242_v13 = vld [vmem:[%s211_s11 + $0x20] sm:$0xff] (!%p203_p9) }
  0x26   : > { %v777_v12 = vpack.c.bf16 (!%p203_p9), %v241_v11, %v240_v9 }
  0x27   : > { %s1156_s15 = smov (!%p232_p10, %s964_s15), 1  ;;  %775 = vmatpush3.bf16.msra.mxu0 %v774_v10  ;;  %vm322_vm2 = vcmask (!%p640_p11), 7168   ;;  %v993_v17 = vmov (!%p640_p11), 0.0  }
  0x28   : > { %s649_s10 = sshll.u32 %s1156_s15, 4  ;;  %776 = vmatprep.subr.bf16.mxu0 %v990_v5  ;;  %323 = vst.msk [vmem:[#allocation2] sm:$0xff] (!%p640_p11), %vm322_vm2, %v993_v17 }
  0x29   : > { %s1090_s23 = scalar_lea.vmem %s1142_s3, %s649_s10 }
  0x2b   : > { %778 = vmatpush3.bf16.msra.mxu0 %v777_v12 }
  0x2c   : > { %698 = vmatprep.subr.mxu0 %v992_v6 }
  0x2f   : > { %699 = vmatpush3.msra.mxu0 %v242_v13 }
  0x30   : > { %701 = vmatmul.mubr.msk.f32.vlgmr.msra.gmra.mrb[0].mxu0 %vm243_vm1, %v237_v14 }
  0xfe   : > { %321 = sbr.rel (%p640_p11) target bundleno = 261 (0x105), region = 74 }
 0x103   : > { %v313_v15 = vpop.f32.mrb[0].mxu0 }
 0x104   : > { %v702_v16 = vpop.f32.mrb[1].mxu0 }
 0x105 PF: > { %779 = vmatprep.subr.bf16.mxu1 %v990_v5  ;;  %735 = vmatprep.mubr.msk.f32.mxu1 %vm991_vm0, %v992_v6  ;;  %v994_v18 = vmov 1.0|1.0   ;;  %s398_s26 = sshra.s32 %s639_s24, 7  ;;  %v324_v19 = vld [vmem:[#allocation2] sm:$0xff]  ;;  %vm396_vm3 = vcmask 7168   ;;  %p642_p12 = scmp.ne.s32.totalorder %s960_s14, 1 }
 0x106   : > { %780 = vmatpush3.bf16.msra.mxu1 %v994_v18  ;;  %s641_s27 = sshll.u32 %s398_s26, 3  ;;  %v978_v25 = vmov (!%p642_p12), 0.0   ;;  %s1102_s29 = smov (!%p642_p12), 0  }
 0x107   : > { %781 = vmatprep.subr.bf16.mxu1 %v990_v5  ;;  %s401_s28 = scalar_lea.vmem %s1090_s23, %s641_s27 }
 0x108   : > { %402 = vst [vmem:[%s401_s28] sm:$0xff] %v313_v15 }
 0x10a   : > { %782 = vmatpush3.bf16.msra.mxu1 %v994_v18 }
 0x10b   : > { %783 = vmatprep.subr.bf16.mxu1 %v990_v5 }
 0x10e   : > { %784 = vmatpush3.bf16.msra.mxu1 %v994_v18 }
 0x10f   : > { %785 = vmatprep.subr.bf16.mxu1 %v990_v5 }
 0x112   : > { %786 = vmatpush3.bf16.msra.mxu1 %v994_v18 }
 0x113   : > { %787 = vmatprep.subr.bf16.mxu1 %v990_v5 }
 0x116   : > { %788 = vmatpush3.bf16.msra.mxu1 %v994_v18 }
 0x117   : > { %789 = vmatprep.subr.bf16.mxu1 %v990_v5 }
 0x11a   : > { %790 = vmatpush3.bf16.msra.mxu1 %v994_v18 }
 0x11b   : > { %791 = vmatprep.subr.bf16.mxu1 %v990_v5 }
 0x11e   : > { %792 = vmatpush3.bf16.msra.mxu1 %v994_v18 }
 0x11f   : > { %793 = vmatprep.subr.bf16.mxu1 %v990_v5 }
 0x122   : > { %794 = vmatpush3.bf16.msra.mxu1 %v994_v18 }
 0x125   : > { %736 = vmatmul.mubr.f32.vlgmr.msra.gmra.mrb[0].mxu1 %v313_v15 }
 0x1f5   : > { %406 = sbr.rel (%p642_p12) target bundleno = 1019 (0x3fb), region = 78 }
 0x1f8   : > { %v391_v20 = vpop.f32.mrb[0].mxu1 }
 0x1f9   : > { %v395_v21 = vadd.f32 %v391_v20, %v324_v19  ;;  %v737_v22 = vpop.f32.mrb[1].mxu1 }
 0x1fb   : > { %397 = vst.msk [vmem:[#allocation2] sm:$0xff] %vm396_vm3, %v395_v21 }
 0x202   : > { %v407_v23 = vld [vmem:[#allocation2] sm:$0xff] }
 0x203   : > { %v1100_v24 = vmul.f32 0.00390625, %v407_v23 }
 0x204 LB: >> { %v995_v26 = vmov 0   ;;  %v996_v27 = vmov 0.0|0.0   ;;  %v997_v28 = vmov 1.0|1.0   ;;  %vm998_vm4 = vmmov 0   ;;  %s643_s14 = sshll.u32 %s984_s29, 7  ;;  %s984_s29 = sphi %s1102_s29, %s414_s29   ;;  %v980_v25 = vphi %v978_v25, %v979_v25  }
 0x205   : >> { %905 = vset.pattern.permute.xlu0 %v995_v26  ;;  %795 = vmatprep.subr.bf16.mxu0 %v996_v27  ;;  %v999_v29 = vmov 0.0   ;;  %s417_s30 = sshra.s32 %s643_s14, 7  ;;  %s414_s29 = sadd.s32 1, %s984_s29  }
 0x206   : >> { %424 = vperm.xlu0 %905, %v1100_v24   ;;  %796 = vmatpush3.bf16.msra.mxu0 %v997_v28  ;;  %s644_s4 = sshll.u32 %s417_s30, 3  ;;  %p411_p13 = scmp.ge.s32.totalorder %s414_s29, 2  }
 0x207   : >> { %797 = vmatprep.subr.bf16.mxu0 %v996_v27  ;;  %770 = vmatprep.mubr.msk.f32.mxu0 %vm998_vm4, %v999_v29  ;;  %s420_s5 = scalar_lea.vmem %s1090_s23, %s644_s4  ;;  %v503_v38 = vld [vmem:[%s1141_s2] sm:$0xff] (%p411_p13)  ;;  %s986_s8 = smov (%p411_p13), 0  }
 0x208   : >> { %v421_v30 = vld [vmem:[%s420_s5] sm:$0xff] }
 0x20a   : >> { %798 = vmatpush3.bf16.msra.mxu0 %v997_v28 }
 0x20b   : >> { %799 = vmatprep.subr.bf16.mxu0 %v996_v27 }
 0x20e   : >> { %800 = vmatpush3.bf16.msra.mxu0 %v997_v28 }
 0x20f   : >> { %801 = vmatprep.subr.bf16.mxu0 %v996_v27 }
 0x212   : >> { %802 = vmatpush3.bf16.msra.mxu0 %v997_v28 }
 0x213   : >> { %803 = vmatprep.subr.bf16.mxu0 %v996_v27 }
 0x216   : >> { %804 = vmatpush3.bf16.msra.mxu0 %v997_v28 }
 0x217   : >> { %805 = vmatprep.subr.bf16.mxu0 %v996_v27 }
 0x21a   : >> { %806 = vmatpush3.bf16.msra.mxu0 %v997_v28 }
 0x21b   : >> { %807 = vmatprep.subr.bf16.mxu0 %v996_v27 }
 0x21e   : >> { %808 = vmatpush3.bf16.msra.mxu0 %v997_v28 }
 0x21f   : >> { %809 = vmatprep.subr.bf16.mxu0 %v996_v27 }
 0x222   : >> { %810 = vmatpush3.bf16.msra.mxu0 %v997_v28 }
 0x285   : >> { %v425_v31 = vpop.permute.xlu0 %424 }
 0x286   : >> { %v427_v32 = vsub.f32 %v421_v30, %v425_v31 }
 0x288   : >> { %v428_v33 = vmul.f32 %v427_v32, %v427_v32 }
 0x28a   : >> { %771 = vmatmul.mubr.f32.vlgmr.msra.gmra.mrb[0].mxu0 %v428_v33 }
 0x35a   : > { %413 = sbr.rel (!%p411_p13) target bundleno = 516 (0x204), region = 130 }
 0x35d   : >> { %v495_v34 = vpop.f32.mrb[0].mxu0 }
 0x35e   : >> { %v499_v35 = vadd.f32 %v980_v25, %v495_v34   ;;  %v772_v36 = vpop.f32.mrb[1].mxu0 }
 0x360   : >> { %v979_v25 = vmov %v499_v35   ;;  %v500_v37 = vmul.f32 (%p411_p13), 0.00390625, %v499_v35 }
 0x362   : > { %v501_v39 = vadd.f32 1e-05, %v500_v37 }
 0x364   : > { %906 = vrsqrt.f32 %v501_v39 }
 0x36e   : > { %v907_v40 = vpop.eup %906 }
 0x36f LB: >> { %v1000_v41 = vmov 0   ;;  %s645_s9 = sshll.u32 %s988_s8, 7  ;;  %s509_s8 = sadd.s32 1, %s988_s8   ;;  %s988_s8 = sphi %s986_s8, %s509_s8  }
 0x370   : >> { %908 = vset.pattern.permute.xlu0 %v1000_v41  ;;  %909 = vset.pattern.permute.xlu1 %v1000_v41  ;;  %s511_s10 = sshra.s32 %s645_s9, 7  ;;  %p506_p0 = scmp.ge.s32.totalorder %s509_s8, 2  }
 0x371   : >> { %518 = vperm.xlu0 %908, %v1100_v24   ;;  %531 = vperm.xlu1 %909, %v503_v38   ;;  %s646_s11 = sshll.u32 %s511_s10, 3 }
 0x372   : >> { %s514_s21 = scalar_lea.vmem %s1090_s23, %s646_s11 }
 0x373   : >> { %v515_v43 = vld [vmem:[%s514_s21] sm:$0xff] }
 0x375   : >> { %524 = vperm.xlu0 %908, %v907_v40  }
 0x3f0   : >> { %v519_v42 = vpop.permute.xlu0 %518  ;;  %v532_v46 = vpop.permute.xlu1 %531 }
 0x3f1   : >> { %v521_v44 = vsub.f32 %v515_v43, %v519_v42 }
 0x3f4   : >> { %v525_v45 = vpop.permute.xlu0 %524  ;;  %508 = sbr.rel (!%p506_p0) target bundleno = 879 (0x36f), region = 141 }
 0x3f5   : >> { %v527_v47 = vmul.f32 %v525_v45, %v521_v44 }
 0x3f7   : >> { %vm528_vm5 = vcmp.ge.f32.partialorder %v527_v47, 0.0  ;;  %v534_v48 = vmul.f32 %v532_v46, %v527_v47 }
 0x3f9   : >> { %v535_v49 = vsel %vm528_vm5, %v527_v47, %v534_v48 }
 0x3fa   : >> { %536 = vst [vmem:[%s514_s21] sm:$0xff] %v535_v49 }
 0x3fb PF: > { %s13_s18 = sadd.s32 1, %s976_s18   ;;  %s1143_s12 = smov %s956_s13 }
 0x3fc   : > { %p10_p1 = scmp.ge.s32.totalorder %s13_s18, 6   ;;  %s1144_s13 = smov %s1072_s25 }
 0x3fd   : > { %s1145_s14 = smov %s968_s16  ;;  %s1146_s15 = smov %s972_s17 }
 0x3fe   : > { %s1147_s16 = smov %s1150_s19  ;;  %s1148_s17 = smov %s1154_s20 }
 0x3ff   :  { %12 = sbr.rel (!%p10_p1) target bundleno = 4 (0x4), region = 152 }

</bundles_post_ra>
